<compile_context>
chip_gen: v5e
topology: v5e:2x2
jax: 0.10.0
libtpu: 0.0.40
codegen_flags: <defaults>
</compile_context>

<pallas_src>
import functools

import jax
import jax.numpy as jnp
from jax.experimental import pallas as pl
from jax.experimental.pallas import tpu as pltpu

TILE_M = 256  # row tile for matmul / layernorm kernels
_PAR = pltpu.CompilerParams(dimension_semantics=("parallel",))


# -----------------------------------------------------------------------------
# Pallas kernels
# -----------------------------------------------------------------------------
def _matmul_bias_kernel(x_ref, w_ref, b_ref, o_ref):
    # o = x @ w + b ; w is bf16, accumulate in f32 on the MXU.
    x = x_ref[...].astype(jnp.bfloat16)
    o_ref[...] = jnp.dot(x, w_ref[...], preferred_element_type=jnp.float32) + b_ref[...]


def _matmul_bias_res_kernel(x_ref, w_ref, b_ref, r_ref, o_ref):
    # o = r + x @ w + b   (residual add fused into the matmul epilogue)
    x = x_ref[...].astype(jnp.bfloat16)
    o_ref[...] = (r_ref[...]
                  + jnp.dot(x, w_ref[...], preferred_element_type=jnp.float32)
                  + b_ref[...])


def _layernorm_kernel(x_ref, g_ref, b_ref, o_ref):
    # LayerNorm over last dim, eps = 1e-5, biased variance (PyTorch semantics).
    x = x_ref[...]
    mean = jnp.mean(x, axis=-1, keepdims=True)
    var = jnp.mean((x - mean) ** 2, axis=-1, keepdims=True)
    o_ref[...] = (x - mean) * jax.lax.rsqrt(var + 1e-5) * g_ref[...] + b_ref[...]


def _ln_matmul_bias_kernel(x_ref, g_ref, bln_ref, w_ref, b_ref, o_ref):
    # o = LayerNorm(x) @ w + b   (LN fused into the consumer projection)
    x = x_ref[...]
    mean = jnp.mean(x, axis=-1, keepdims=True)
    var = jnp.mean((x - mean) ** 2, axis=-1, keepdims=True)
    xn = (x - mean) * jax.lax.rsqrt(var + 1e-5) * g_ref[...] + bln_ref[...]
    o_ref[...] = (jnp.dot(xn.astype(jnp.bfloat16), w_ref[...],
                          preferred_element_type=jnp.float32) + b_ref[...])


def _matmul_bias_ln_kernel(x_ref, w_ref, b_ref, g_ref, bln_ref, o_ref):
    # o = LayerNorm(x @ w + b)   (patch-embed conv-as-matmul fused with its norm)
    x = x_ref[...].astype(jnp.bfloat16)
    y = jnp.dot(x, w_ref[...], preferred_element_type=jnp.float32) + b_ref[...]
    mean = jnp.mean(y, axis=-1, keepdims=True)
    var = jnp.mean((y - mean) ** 2, axis=-1, keepdims=True)
    o_ref[...] = (y - mean) * jax.lax.rsqrt(var + 1e-5) * g_ref[...] + bln_ref[...]


def _attn_kernel(q_ref, kv_ref, o_ref, *, head, d, scale):
    # One batch element per grid step; all heads processed in-kernel and the
    # output written back as a single lane-dense (N, C) slab.
    C = head * d
    q = q_ref[0]          # (N, C)   f32
    kv = kv_ref[0]        # (M, 2C)  f32
    outs = []
    for h in range(head):                                 # static unroll, head <= 8
        qh = q[:, h * d:(h + 1) * d].astype(jnp.bfloat16)
        kh = kv[:, h * d:(h + 1) * d].astype(jnp.bfloat16)
        vh = kv[:, C + h * d:C + (h + 1) * d].astype(jnp.bfloat16)
        s = jax.lax.dot_general(qh, kh, (((1,), (1,)), ((), ())),
                                preferred_element_type=jnp.float32) * scale
        s = s - jnp.max(s, axis=-1, keepdims=True)
        p = jnp.exp(s)
        p = p * pl.reciprocal(jnp.sum(p, axis=-1, keepdims=True), approx=True)
        outs.append(jnp.dot(p.astype(jnp.bfloat16), vh,
                            preferred_element_type=jnp.float32))
    o_ref[0] = jnp.concatenate(outs, axis=-1)


def _dwconv_gelu_kernel(x_ref, w_ref, b_ref, o_ref, *, H, W):
    # 3x3 depthwise conv (stride 1, pre-padded input) + bias + exact (erf) GELU.
    x = x_ref[0]          # (H+2, W+2, C)
    w = w_ref[...]        # (9, C)  tap order (dh, dw)
    b = b_ref[...]        # (1, C)
    acc = jnp.zeros(o_ref.shape[1:], jnp.float32)
    for dh in range(3):
        for dw in range(3):
            tap = x[dh:dh + H, dw:dw + W, :]
            acc = acc + tap * w[dh * 3 + dw:dh * 3 + dw + 1, :]
    acc = acc + b
    o_ref[0] = jax.nn.gelu(acc, approximate=False)


# -----------------------------------------------------------------------------
# pallas_call wrappers (all M-tiled with a "parallel" grid dimension)
# -----------------------------------------------------------------------------
def _row_grid(M):
    tm = M if M <= TILE_M else TILE_M
    return tm, (pl.cdiv(M, tm),)


def matmul_bias(x, w, b):
    M, K = x.shape
    N = w.shape[1]
    tm, grid = _row_grid(M)
    return pl.pallas_call(
        _matmul_bias_kernel,
        out_shape=jax.ShapeDtypeStruct((M, N), jnp.float32),
        grid=grid,
        in_specs=[pl.BlockSpec((tm, K), lambda i: (i, 0)),
                  pl.BlockSpec((K, N), lambda i: (0, 0)),
                  pl.BlockSpec((1, N), lambda i: (0, 0))],
        out_specs=pl.BlockSpec((tm, N), lambda i: (i, 0)),
        compiler_params=_PAR,
    )(x, w, b)


def matmul_bias_res(x, w, b, resid):
    M, K = x.shape
    N = w.shape[1]
    tm, grid = _row_grid(M)
    return pl.pallas_call(
        _matmul_bias_res_kernel,
        out_shape=jax.ShapeDtypeStruct((M, N), jnp.float32),
        grid=grid,
        in_specs=[pl.BlockSpec((tm, K), lambda i: (i, 0)),
                  pl.BlockSpec((K, N), lambda i: (0, 0)),
                  pl.BlockSpec((1, N), lambda i: (0, 0)),
                  pl.BlockSpec((tm, N), lambda i: (i, 0))],
        out_specs=pl.BlockSpec((tm, N), lambda i: (i, 0)),
        compiler_params=_PAR,
    )(x, w, b, resid)


def layernorm(x2d, g, b):
    M, C = x2d.shape
    tm, grid = _row_grid(M)
    return pl.pallas_call(
        _layernorm_kernel,
        out_shape=jax.ShapeDtypeStruct((M, C), jnp.float32),
        grid=grid,
        in_specs=[pl.BlockSpec((tm, C), lambda i: (i, 0)),
                  pl.BlockSpec((1, C), lambda i: (0, 0)),
                  pl.BlockSpec((1, C), lambda i: (0, 0))],
        out_specs=pl.BlockSpec((tm, C), lambda i: (i, 0)),
        compiler_params=_PAR,
    )(x2d, g, b)


def ln_matmul_bias(x, g, bln, w, b):
    M, C = x.shape
    N = w.shape[1]
    tm, grid = _row_grid(M)
    return pl.pallas_call(
        _ln_matmul_bias_kernel,
        out_shape=jax.ShapeDtypeStruct((M, N), jnp.float32),
        grid=grid,
        in_specs=[pl.BlockSpec((tm, C), lambda i: (i, 0)),
                  pl.BlockSpec((1, C), lambda i: (0, 0)),
                  pl.BlockSpec((1, C), lambda i: (0, 0)),
                  pl.BlockSpec((C, N), lambda i: (0, 0)),
                  pl.BlockSpec((1, N), lambda i: (0, 0))],
        out_specs=pl.BlockSpec((tm, N), lambda i: (i, 0)),
        compiler_params=_PAR,
    )(x, g, bln, w, b)


def matmul_bias_ln(x, w, b, g, bln):
    M, K = x.shape
    N = w.shape[1]
    tm, grid = _row_grid(M)
    return pl.pallas_call(
        _matmul_bias_ln_kernel,
        out_shape=jax.ShapeDtypeStruct((M, N), jnp.float32),
        grid=grid,
        in_specs=[pl.BlockSpec((tm, K), lambda i: (i, 0)),
                  pl.BlockSpec((K, N), lambda i: (0, 0)),
                  pl.BlockSpec((1, N), lambda i: (0, 0)),
                  pl.BlockSpec((1, N), lambda i: (0, 0)),
                  pl.BlockSpec((1, N), lambda i: (0, 0))],
        out_specs=pl.BlockSpec((tm, N), lambda i: (i, 0)),
        compiler_params=_PAR,
    )(x, w, b, g, bln)


def attn_call(q, kv, head, d, scale):
    B, N, C = q.shape
    M = kv.shape[1]
    kern = functools.partial(_attn_kernel, head=head, d=d, scale=scale)
    return pl.pallas_call(
        kern,
        out_shape=jax.ShapeDtypeStruct((B, N, C), jnp.float32),
        grid=(B,),
        in_specs=[pl.BlockSpec((1, N, C), lambda i: (i, 0, 0)),
                  pl.BlockSpec((1, M, 2 * C), lambda i: (i, 0, 0))],
        out_specs=pl.BlockSpec((1, N, C), lambda i: (i, 0, 0)),
        compiler_params=_PAR,
    )(q, kv)


def dwconv_gelu_call(x_pad, w, b, H, W):
    B, Hp, Wp, C = x_pad.shape
    kern = functools.partial(_dwconv_gelu_kernel, H=H, W=W)
    return pl.pallas_call(
        kern,
        out_shape=jax.ShapeDtypeStruct((B, H, W, C), jnp.float32),
        grid=(B,),
        in_specs=[pl.BlockSpec((1, Hp, Wp, C), lambda i: (i, 0, 0, 0)),
                  pl.BlockSpec((9, C), lambda i: (0, 0)),
                  pl.BlockSpec((1, C), lambda i: (0, 0))],
        out_specs=pl.BlockSpec((1, H, W, C), lambda i: (i, 0, 0, 0)),
        compiler_params=_PAR,
    )(x_pad, w, b)


# -----------------------------------------------------------------------------
# Plain-JAX glue: im2col patch extraction for (patch-embed / sr) convolutions
# TODO(synk): patch extraction is host-side JAX glue; an in-kernel strided DMA
# gather (memory_space=pl.ANY) would avoid materializing the k^2-expanded tensor.
# -----------------------------------------------------------------------------
def im2col(x_nhwc, k, stride, pad):
    B, H, W, C = x_nhwc.shape
    x_p = jnp.pad(x_nhwc, ((0, 0), (pad, pad), (pad, pad), (0, 0)))
    Hout = (H + 2 * pad - k) // stride + 1
    Wout = (W + 2 * pad - k) // stride + 1
    cols = []
    for dh in range(k):
        for dw in range(k):
            cols.append(x_p[:, dh:dh + stride * (Hout - 1) + 1:stride,
                            dw:dw + stride * (Wout - 1) + 1:stride, :])
    patches = jnp.concatenate(cols, axis=-1)           # (B, Hout, Wout, k*k*C)
    return patches.reshape(B * Hout * Wout, k * k * C), Hout, Wout


# -----------------------------------------------------------------------------
# Parameters (deterministic synthetic init; matmul weights stored in bf16)
# -----------------------------------------------------------------------------
mit_settings = {'B0': [[32, 64, 160, 256], [2, 2, 2, 2]],
                'B1': [[64, 128, 320, 512], [2, 2, 2, 2]]}
HEADS = [1, 2, 5, 8]
SR_RATIOS = [8, 4, 2, 1]
PE_CFG = [(7, 4, 3), (3, 2, 1), (3, 2, 1), (3, 2, 1)]   # (kernel, stride, pad)


def linear_params(key, cin, cout):
    k1, k2 = jax.random.split(key)
    return {'w': (jax.random.normal(k1, (cin, cout), jnp.float32) * 0.02
                  ).astype(jnp.bfloat16),
            'b': jax.random.normal(k2, (1, cout), jnp.float32) * 0.02}


def ln_params(c):
    return {'g': jnp.ones((1, c), jnp.float32), 'b': jnp.zeros((1, c), jnp.float32)}


def conv_params(key, cin, cout, k):
    # Weight stored pre-reshaped to the im2col (dh, dw, cin) feature order, bf16.
    k1, k2 = jax.random.split(key)
    return {'w': (jax.random.normal(k1, (k * k * cin, cout), jnp.float32) * 0.02
                  ).astype(jnp.bfloat16),
            'b': jax.random.normal(k2, (1, cout), jnp.float32) * 0.02}


def dwconv_params(key, c):
    k1, k2 = jax.random.split(key)
    return {'w': jax.random.normal(k1, (9, c), jnp.float32) * 0.02,
            'b': jax.random.normal(k2, (1, c), jnp.float32) * 0.02}


def build_params(key, model_name='B0'):
    dims, depths = mit_settings[model_name]
    params = {}
    skeys = jax.random.split(key, 4)
    cin_prev = 3
    for i in range(4):
        dim = dims[i]
        ksz, _, _ = PE_CFG[i]
        kstage = jax.random.split(skeys[i], 2 + depths[i])
        stage = {'patch_embed': {'conv': conv_params(kstage[0], cin_prev, dim, ksz),
                                 'norm': ln_params(dim)},
                 'blocks': [],
                 'norm': ln_params(dim)}
        for bidx in range(depths[i]):
            kb = jax.random.split(kstage[2 + bidx], 8)
            blk = {'norm1': ln_params(dim), 'norm2': ln_params(dim),
                   'attn': {'proj': linear_params(kb[2], dim, dim)},
                   'mlp': {'fc1': linear_params(kb[3], dim, 4 * dim),
                           'dw': dwconv_params(kb[4], 4 * dim),
                           'fc2': linear_params(kb[5], 4 * dim, dim)}}
            if SR_RATIOS[i] > 1:
                blk['attn']['q'] = linear_params(kb[0], dim, dim)
                blk['attn']['kv'] = linear_params(kb[1], dim, 2 * dim)
                blk['attn']['sr'] = conv_params(kb[6], dim, dim, SR_RATIOS[i])
                blk['attn']['sr_norm'] = ln_params(dim)
            else:
                # fused q+kv projection (C -> 3C): equivalent to separate q / kv
                blk['attn']['qkv'] = linear_params(kb[0], dim, 3 * dim)
            stage['blocks'].append(blk)
        params[f'stage{i + 1}'] = stage
        cin_prev = dim
    return params


# -----------------------------------------------------------------------------
# Forward pass (mirrors the PyTorch module)
# -----------------------------------------------------------------------------
def block(x, H, W, p, head, sr_ratio):
    # TODO(synk): DropPath (stochastic depth) is identity at inference; the
    # training-time stochastic drop is not reproduced.
    B, N, C = x.shape
    d = C // head
    scale = float(d) ** -0.5
    x2 = x.reshape(B * N, C)
    ap = p['attn']

    # ---- attention (norm1 fused into the q/kv projections) ----
    if sr_ratio == 1:
        qkv = ln_matmul_bias(x2, p['norm1']['g'], p['norm1']['b'],
                             ap['qkv']['w'], ap['qkv']['b']).reshape(B, N, 3 * C)
        q, kv = qkv[:, :, :C], qkv[:, :, C:]
    else:
        xn = layernorm(x2, p['norm1']['g'], p['norm1']['b'])
        q = matmul_bias(xn, ap['q']['w'], ap['q']['b']).reshape(B, N, C)
        # spatial-reduction conv on the normalized tokens (im2col + matmul)
        patches, Hs, Ws = im2col(xn.reshape(B, H, W, C), sr_ratio, sr_ratio, 0)
        sr_out = matmul_bias(patches, ap['sr']['w'], ap['sr']['b'])
        # sr LayerNorm fused into the KV projection
        kv = ln_matmul_bias(sr_out, ap['sr_norm']['g'], ap['sr_norm']['b'],
                            ap['kv']['w'], ap['kv']['b']).reshape(B, Hs * Ws, 2 * C)

    attn_out = attn_call(q, kv, head, d, scale)                     # (B, N, C)
    x2 = matmul_bias_res(attn_out.reshape(B * N, C),
                         ap['proj']['w'], ap['proj']['b'], x2)       # + residual

    # ---- MLP (norm2 fused into fc1, residual fused into fc2) ----
    mp = p['mlp']
    hidden = mp['fc1']['w'].shape[1]
    h = ln_matmul_bias(x2, p['norm2']['g'], p['norm2']['b'],
                       mp['fc1']['w'], mp['fc1']['b']).reshape(B, H, W, hidden)
    h_pad = jnp.pad(h, ((0, 0), (1, 1), (1, 1), (0, 0)))
    g = dwconv_gelu_call(h_pad, mp['dw']['w'], mp['dw']['b'], H, W)  # dwconv+GELU
    x2 = matmul_bias_res(g.reshape(B * N, hidden),
                         mp['fc2']['w'], mp['fc2']['b'], x2)         # + residual
    return x2.reshape(B, N, C)


def patch_embed(x_nhwc, p, k, stride, pad):
    B = x_nhwc.shape[0]
    cout = p['conv']['b'].shape[-1]
    patches, Hout, Wout = im2col(x_nhwc, k, stride, pad)
    y = matmul_bias_ln(patches, p['conv']['w'], p['conv']['b'],
                       p['norm']['g'], p['norm']['b'])   # conv-as-matmul + LN fused
    return y.reshape(B, Hout * Wout, cout), Hout, Wout


def mit_forward(params, x_nchw, model_name='B0'):
    x = jnp.transpose(x_nchw, (0, 2, 3, 1))              # NCHW -> NHWC internal
    B = x.shape[0]
    outs = []
    for i in range(4):
        st = params[f'stage{i + 1}']
        ksz, stride, pad = PE_CFG[i]
        y, H, W = patch_embed(x, st['patch_embed'], ksz, stride, pad)
        for bp in st['blocks']:
            y = block(y, H, W, bp, HEADS[i], SR_RATIOS[i])
        C = y.shape[-1]
        y = layernorm(y.reshape(B * H * W, C),
                      st['norm']['g'], st['norm']['b']).reshape(B, H, W, C)
        outs.append(jnp.transpose(y, (0, 3, 1, 2)))       # return NCHW like PyTorch
        x = y                                             # NHWC input for next stage
    return tuple(outs)


# -----------------------------------------------------------------------------
if __name__ == "__main__":
    key = jax.random.PRNGKey(0)
    pkey, xkey = jax.random.split(key)
    params = build_params(pkey, 'B0')
    # NCHW input like the PyTorch module; 32x32 -> stage spatials 8, 4, 2, 1
    x = jax.random.normal(xkey, (2, 3, 32, 32), jnp.float32)
    x1, x2, x3, x4 = mit_forward(params, x, 'B0')
    for o in (x1, x2, x3, x4):
        jax.block_until_ready(o)
    assert x1.shape == (2, 32, 8, 8)
    assert x2.shape == (2, 64, 4, 4)
    assert x3.shape == (2, 160, 2, 2)
    assert x4.shape == (2, 256, 1, 1)
    print("KERNEL_OK")
</pallas_src>

<mosaic_0001>
module attributes {stable_mosaic.version = 11 : i64} {
  func.func @_matmul_bias_ln_kernel(%arg0: i32, %arg1: memref<128x147xf32, #tpu.memory_space<vmem>>, %arg2: memref<147x32xbf16, #tpu.memory_space<vmem>>, %arg3: memref<1x32xf32, #tpu.memory_space<vmem>>, %arg4: memref<1x32xf32, #tpu.memory_space<vmem>>, %arg5: memref<1x32xf32, #tpu.memory_space<vmem>>, %arg6: memref<128x32xf32, #tpu.memory_space<vmem>>) attributes {dimension_semantics = [#tpu.dimension_semantics<parallel>], iteration_bounds = array<i64: 1>, scalar_prefetch = 0 : i64, scratch_operands = 0 : i64, tpu.core_type = #tpu.core_type<tc>, window_params = [{transform_indices = @transform_0, window_bounds = array<i64: 128, 147>}, {pipeline_mode = #tpu.pipeline_mode<synchronous>, transform_indices = @transform_1, window_bounds = array<i64: 147, 32>}, {pipeline_mode = #tpu.pipeline_mode<synchronous>, transform_indices = @transform_2, window_bounds = array<i64: 1, 32>}, {pipeline_mode = #tpu.pipeline_mode<synchronous>, transform_indices = @transform_3, window_bounds = array<i64: 1, 32>}, {pipeline_mode = #tpu.pipeline_mode<synchronous>, transform_indices = @transform_4, window_bounds = array<i64: 1, 32>}, {transform_indices = @transform_5, window_bounds = array<i64: 128, 32>}]} {
    %c0 = arith.constant 0 : index
    %c0_0 = arith.constant 0 : index
    %0 = vector.load %arg1[%c0, %c0_0] : memref<128x147xf32, #tpu.memory_space<vmem>>, vector<128x147xf32>
    %1 = arith.truncf %0 : vector<128x147xf32> to vector<128x147xbf16>
    %c0_1 = arith.constant 0 : index
    %c0_2 = arith.constant 0 : index
    %2 = vector.load %arg2[%c0_1, %c0_2] : memref<147x32xbf16, #tpu.memory_space<vmem>>, vector<147x32xbf16>
    %cst = arith.constant dense<0.000000e+00> : vector<128x32xf32>
    %3 = tpu.matmul %1, %2, %cst {dimension_numbers = #tpu.dot_dimension_numbers<[1], [0], [0], [1], [0, 0, 1, 1], [], []>} : vector<128x147xbf16>, vector<147x32xbf16>, vector<128x32xf32> -> vector<128x32xf32>
    %c0_3 = arith.constant 0 : index
    %c0_4 = arith.constant 0 : index
    %4 = vector.load %arg3[%c0_3, %c0_4] : memref<1x32xf32, #tpu.memory_space<vmem>>, vector<1x32xf32>
    %5 = vector.broadcast %4 : vector<1x32xf32> to vector<128x32xf32>
    %6 = arith.addf %3, %5 : vector<128x32xf32>
    %cst_5 = arith.constant dense<0.000000e+00> : vector<128xf32>
    %7 = vector.multi_reduction <add>, %6, %cst_5 [1] : vector<128x32xf32> to vector<128xf32>
    %8 = vector.shape_cast %7 : vector<128xf32> to vector<128x1xf32>
    %cst_6 = arith.constant 3.200000e+01 : f32
    %9 = vector.broadcast %cst_6 : f32 to vector<128x1xf32>
    %10 = arith.divf %8, %9 : vector<128x1xf32>
    %11 = vector.broadcast %10 : vector<128x1xf32> to vector<128x32xf32>
    %12 = arith.subf %6, %11 : vector<128x32xf32>
    %13 = arith.mulf %12, %12 : vector<128x32xf32>
    %cst_7 = arith.constant dense<0.000000e+00> : vector<128xf32>
    %14 = vector.multi_reduction <add>, %13, %cst_7 [1] : vector<128x32xf32> to vector<128xf32>
    %15 = vector.shape_cast %14 : vector<128xf32> to vector<128x1xf32>
    %cst_8 = arith.constant 3.200000e+01 : f32
    %16 = vector.broadcast %cst_8 : f32 to vector<128x1xf32>
    %17 = arith.divf %15, %16 : vector<128x1xf32>
    %18 = vector.broadcast %10 : vector<128x1xf32> to vector<128x32xf32>
    %19 = arith.subf %6, %18 : vector<128x32xf32>
    %cst_9 = arith.constant 9.99999974E-6 : f32
    %20 = vector.broadcast %cst_9 : f32 to vector<128x1xf32>
    %21 = arith.addf %17, %20 : vector<128x1xf32>
    %22 = math.rsqrt %21 : vector<128x1xf32>
    %23 = vector.broadcast %22 : vector<128x1xf32> to vector<128x32xf32>
    %24 = arith.mulf %19, %23 : vector<128x32xf32>
    %c0_10 = arith.constant 0 : index
    %c0_11 = arith.constant 0 : index
    %25 = vector.load %arg4[%c0_10, %c0_11] : memref<1x32xf32, #tpu.memory_space<vmem>>, vector<1x32xf32>
    %26 = vector.broadcast %25 : vector<1x32xf32> to vector<128x32xf32>
    %27 = arith.mulf %24, %26 : vector<128x32xf32>
    %c0_12 = arith.constant 0 : index
    %c0_13 = arith.constant 0 : index
    %28 = vector.load %arg5[%c0_12, %c0_13] : memref<1x32xf32, #tpu.memory_space<vmem>>, vector<1x32xf32>
    %29 = vector.broadcast %28 : vector<1x32xf32> to vector<128x32xf32>
    %30 = arith.addf %27, %29 : vector<128x32xf32>
    %c0_14 = arith.constant 0 : index
    %c0_15 = arith.constant 0 : index
    %31 = vector.load %arg6[%c0_14, %c0_15] : memref<128x32xf32, #tpu.memory_space<vmem>>, vector<128x32xf32>
    tpu.vector_store %arg6[%c0_14, %c0_15], %30 {strides = array<i32>} : memref<128x32xf32, #tpu.memory_space<vmem>>, vector<128x32xf32>,
    return
  }
  func.func @transform_0(%arg0: i32) -> (i32, i32) {
    %c0_i32 = arith.constant 0 : i32
    %c0_i32_0 = arith.constant 0 : i32
    return %arg0, %c0_i32 : i32, i32
  }
  func.func @transform_1(%arg0: i32) -> (i32, i32) {
    %c0_i32 = arith.constant 0 : i32
    %c0_i32_0 = arith.constant 0 : i32
    %c0_i32_1 = arith.constant 0 : i32
    return %c0_i32, %c0_i32_0 : i32, i32
  }
  func.func @transform_2(%arg0: i32) -> (i32, i32) {
    %c0_i32 = arith.constant 0 : i32
    %c0_i32_0 = arith.constant 0 : i32
    %c0_i32_1 = arith.constant 0 : i32
    return %c0_i32, %c0_i32_0 : i32, i32
  }
  func.func @transform_3(%arg0: i32) -> (i32, i32) {
    %c0_i32 = arith.constant 0 : i32
    %c0_i32_0 = arith.constant 0 : i32
    %c0_i32_1 = arith.constant 0 : i32
    return %c0_i32, %c0_i32_0 : i32, i32
  }
  func.func @transform_4(%arg0: i32) -> (i32, i32) {
    %c0_i32 = arith.constant 0 : i32
    %c0_i32_0 = arith.constant 0 : i32
    %c0_i32_1 = arith.constant 0 : i32
    return %c0_i32, %c0_i32_0 : i32, i32
  }
  func.func @transform_5(%arg0: i32) -> (i32, i32) {
    %c0_i32 = arith.constant 0 : i32
    %c0_i32_0 = arith.constant 0 : i32
    return %arg0, %c0_i32 : i32, i32
  }
}

</mosaic_0001>

<bundles_post_ra>
// kernel: tpu_custom_call.1
= control target key start
LH: loop header
LB: loop body
LE: loop exit
PB: predicated region body
PF: predicated region fallthrough
CT: control target
= control target key end

     0   :  { %vm174_vm0 = vcmask 1040384   ;;  %vm175_vm1 = vcmask 1041408   ;;  %v801_v2 = vmov 65535   ;;  %vm149_vm2 = vcmask 154624   ;;  %s1357_s1 = inlined_call_operand.vmem [shape: bf16[147,32], index: 1, kind: input, shape index: {}]   ;;  %s1358_s0 = inlined_call_operand.vmem [shape: f32[128,147], index: 0, kind: input, shape index: {}]   ;;  %s1359_s2 = inlined_call_operand.vmem [shape: f32[1,32], index: 2, kind: input, shape index: {}]   ;;  %s1360_s3 = inlined_call_operand.vmem [shape: f32[1,32], index: 3, kind: input, shape index: {}]   ;;  %s1361_s4 = inlined_call_operand.vmem [shape: f32[1,32], index: 4, kind: input, shape index: {}]   ;;  %s1362_s5 = inlined_call_operand.vmem [shape: f32[128,32], index: 5, kind: output, shape index: {}]  }
   0x1   :  { %v750_v0 = vld [vmem:[%s1357_s1 + $0x38] sm:$0xff]  ;;  %v87_v1 = vld [vmem:[%s1357_s1 + $0x48] sm:$0x3]  ;;  %v176_v3 = vsel %vm174_vm0, 4294967295, %v801_v2  ;;  %v749_v5 = vld [vmem:[%s1357_s1 + $0x30] sm:$0xff]  ;;  %vm279_vm3 = vcmask 261120  }
   0x2   :  { %v129_v4 = vunpack.c.l.b16 %v87_v1  ;;  %181 = vmatpush.bf16.msra.mxu0 %v750_v0  ;;  %752 = vmatpush.bf16.msra.mxu2 %v750_v0  ;;  %v177_v6 = vsel %vm175_vm1, %v176_v3, 0  ;;  %v748_v9 = vld [vmem:[%s1357_s1 + $0x28] sm:$0xff]  ;;  %v751_v10 = vld [vmem:[%s1357_s1 + $0x40] sm:$0xff]  ;;  %v24_v12 = vld [vmem:[%s1358_s0 + $0x18] sm:$0xff] }
   0x3   :  { %v22_v11 = vld [vmem:[%s1358_s0 + $0x8] sm:$0xff]  ;;  %v747_v14 = vld [vmem:[%s1357_s1 + $0x20] sm:$0xff]  ;;  %v44_v16 = vld [vmem:[%s1358_s0 + $0xb8] sm:$0xff] }
   0x4   :  { %v139_v7 = vpack.c.b16 %v129_v4, %v129_v4  ;;  %v54_v13 = vpack.c.bf16 %v24_v12, %v22_v11  ;;  %v42_v15 = vld [vmem:[%s1358_s0 + $0xa8] sm:$0xff]  ;;  %v746_v18 = vld [vmem:[%s1357_s1 + $0x18] sm:$0xff]  ;;  %v745_v19 = vld [vmem:[%s1357_s1 + $0x10] sm:$0xff] }
   0x5   :  { %v64_v17 = vpack.c.bf16 %v44_v16, %v42_v15  ;;  %v744_v20 = vld [vmem:[%s1357_s1 + $0x8] sm:$0xff]  ;;  %v28_v22 = vld [vmem:[%s1358_s0 + $0x38] sm:$0xff]  ;;  %v743_v23 = vld [vmem:[%s1357_s1] sm:$0xff] }
   0x6   :  { %v179_v8 = vand.u32 %v177_v6, %v139_v7  ;;  %182 = vmatpush.bf16.msra.mxu0 %v749_v5  ;;  %753 = vmatpush.bf16.msra.mxu2 %v749_v5  ;;  %v26_v21 = vld [vmem:[%s1358_s0 + $0x28] sm:$0xff]  ;;  %v21_v25 = vld [vmem:[%s1358_s0] sm:$0xff]  ;;  %v23_v26 = vld [vmem:[%s1358_s0 + $0x10] sm:$0xff] }
   0x7   :  { %v56_v24 = vpack.c.bf16 %v28_v22, %v26_v21  ;;  %v37_v27 = vld [vmem:[%s1358_s0 + $0x80] sm:$0xff]  ;;  %v39_v28 = vld [vmem:[%s1358_s0 + $0x90] sm:$0xff]  ;;  %v46_v29 = vld [vmem:[%s1358_s0 + $0xc8] sm:$0xff]  ;;  %v53_v32 = vpack.c.bf16 %v23_v26, %v21_v25 }
   0x8   :  { %236 = vmatpush.bf16.msra.mxu1 %v179_v8  ;;  %760 = vmatpush.bf16.msra.mxu3 %v179_v8  ;;  %v48_v30 = vld [vmem:[%s1358_s0 + $0xd8] sm:$0xff]  ;;  %v61_v33 = vpack.c.bf16 %v39_v28, %v37_v27  ;;  %v30_v34 = vld [vmem:[%s1358_s0 + $0x48] sm:$0xff]  ;;  %v25_v37 = vld [vmem:[%s1358_s0 + $0x20] sm:$0xff] }
   0x9   :  { %v66_v31 = vpack.c.bf16 %v48_v30, %v46_v29  ;;  %v32_v35 = vld [vmem:[%s1358_s0 + $0x58] sm:$0xff]  ;;  %v27_v38 = vld [vmem:[%s1358_s0 + $0x30] sm:$0xff]  ;;  %v41_v39 = vld [vmem:[%s1358_s0 + $0xa0] sm:$0xff] }
   0xa   :  { %183 = vmatpush.bf16.msra.mxu0 %v748_v9  ;;  %754 = vmatpush.bf16.msra.mxu2 %v748_v9  ;;  %v58_v36 = vpack.c.bf16 %v32_v35, %v30_v34  ;;  %v43_v40 = vld [vmem:[%s1358_s0 + $0xb0] sm:$0xff]  ;;  %v50_v41 = vld [vmem:[%s1358_s0 + $0xe8] sm:$0xff]  ;;  %v52_v42 = vld [vmem:[%s1358_s0 + $0xf8] sm:$0xff]  ;;  %v55_v44 = vpack.c.bf16 %v27_v38, %v25_v37 }
   0xb   :  { %v68_v43 = vpack.c.bf16 %v52_v42, %v50_v41  ;;  %v63_v45 = vpack.c.bf16 %v43_v40, %v41_v39  ;;  %v34_v46 = vld [vmem:[%s1358_s0 + $0x68] sm:$0xff]  ;;  %v36_v47 = vld [vmem:[%s1358_s0 + $0x78] sm:$0xff]  ;;  %v29_v49 = vld [vmem:[%s1358_s0 + $0x40] sm:$0xff] }
   0xc   :  { %237 = vmatpush.bf16.msra.mxu1 %v751_v10  ;;  %761 = vmatpush.bf16.msra.mxu3 %v751_v10  ;;  %v60_v48 = vpack.c.bf16 %v36_v47, %v34_v46  ;;  %v31_v50 = vld [vmem:[%s1358_s0 + $0x50] sm:$0xff]  ;;  %v45_v51 = vld [vmem:[%s1358_s0 + $0xc0] sm:$0xff]  ;;  %v38_v55 = vld [vmem:[%s1358_s0 + $0x88] sm:$0xff] }
   0xd   :  { %v47_v52 = vld [vmem:[%s1358_s0 + $0xd0] sm:$0xff]  ;;  %v57_v53 = vpack.c.bf16 %v31_v50, %v29_v49  ;;  %v40_v56 = vld [vmem:[%s1358_s0 + $0x98] sm:$0xff]  ;;  %v33_v58 = vld [vmem:[%s1358_s0 + $0x60] sm:$0xff] }
   0xe   :  { %184 = vmatpush.bf16.msra.mxu0 %v747_v14  ;;  %755 = vmatpush.bf16.msra.mxu2 %v747_v14  ;;  %v65_v54 = vpack.c.bf16 %v47_v52, %v45_v51  ;;  %v62_v57 = vpack.c.bf16 %v40_v56, %v38_v55  ;;  %v35_v59 = vld [vmem:[%s1358_s0 + $0x70] sm:$0xff]  ;;  %v49_v60 = vld [vmem:[%s1358_s0 + $0xe0] sm:$0xff] }
   0xf   :  { %735 = vmatmul.msk.bf16.vlgmr.msra.gmra.mxu1 %vm149_vm2, %v54_v13  ;;  %740 = vmatmul.msk.bf16.vlgmr.msra.gmra.mxu3 %vm149_vm2, %v64_v17  ;;  %v51_v61 = vld [vmem:[%s1358_s0 + $0xf0] sm:$0xff]  ;;  %v59_v62 = vpack.c.bf16 %v35_v59, %v33_v58  ;;  %v970_v3 = vld [vmem:[%s1359_s2] ss:$0 sm:$0xff] }
  0x10   :  { %v67_v63 = vpack.c.bf16 %v51_v61, %v49_v60 }
  0x12   :  { %185 = vmatpush.bf16.msra.mxu0 %v746_v18  ;;  %756 = vmatpush.bf16.msra.mxu2 %v746_v18 }
  0x16   :  { %186 = vmatpush.bf16.msra.mxu0 %v745_v19  ;;  %757 = vmatpush.bf16.msra.mxu2 %v745_v19 }
  0x1a   :  { %187 = vmatpush.bf16.msra.mxu0 %v744_v20  ;;  %758 = vmatpush.bf16.msra.mxu2 %v744_v20 }
  0x1e   :  { %188 = vmatpush.bf16.msra.mxu0 %v743_v23  ;;  %759 = vmatpush.bf16.msra.mxu2 %v743_v23 }
  0x1f   :  { %736 = vmatmul.msk.bf16.gmra.mxu1 %vm149_vm2, %v56_v24  ;;  %741 = vmatmul.msk.bf16.gmra.mxu3 %vm149_vm2, %v66_v31 }
  0x21   :  { %189 = vmatmul.bf16.vlgmr.msra.gmra.mxu0 %v53_v32  ;;  %209 = vmatmul.bf16.vlgmr.msra.gmra.mxu2 %v61_v33 }
  0x2f   :  { %737 = vmatmul.msk.bf16.gmra.mxu1 %vm149_vm2, %v58_v36  ;;  %742 = vmatmul.msk.bf16.gmra.mxu3 %vm149_vm2, %v68_v43 }
  0x31   :  { %194 = vmatmul.bf16.gmra.mxu0 %v55_v44  ;;  %214 = vmatmul.bf16.gmra.mxu2 %v63_v45 }
  0x3f   :  { %738 = vmatmul.msk.bf16.gmra.mxu1 %vm149_vm2, %v60_v48 }
  0x41   :  { %199 = vmatmul.bf16.gmra.mxu0 %v57_v53  ;;  %219 = vmatmul.bf16.gmra.mxu2 %v65_v54 }
  0x4f   :  { %739 = vmatmul.msk.bf16.gmra.mxu1 %vm149_vm2, %v62_v57 }
  0x51   :  { %204 = vmatmul.bf16.gmra.mxu0 %v59_v62  ;;  %224 = vmatmul.bf16.gmra.mxu2 %v67_v63 }
  0x8c   :  { %v239_v0 = vpop.f32.mrf.mxu1 }
  0x92   :  { %v264_v16 = vpop.f32.mrf.mxu3 }
  0x94   :  { %v241_v1 = vpop.f32.mrf.mxu1 }
  0x9a   :  { %v266_v25 = vpop.f32.mrf.mxu3 }
  0x9c   :  { %v244_v2 = vpop.f32.mrf.mxu1 }
  0x9e   :  { %v190_v4 = vpop.f32.mrf.mxu0 }
  0x9f   :  { %v191_v5 = vadd.f32 %v970_v3, %v190_v4 }
  0xa1   :  { %v973_v6 = vadd.f32 %v239_v0, %v191_v5 }
  0xa2   :  { %v269_v35 = vpop.f32.mrf.mxu3 }
  0xa3   :  { %v280_v8 = vsel %vm279_vm3, %v973_v6, 0.0 }
  0xa4   :  { %v246_v7 = vpop.f32.mrf.mxu1  ;;  %281 = vadd.xlane.f32.xlu0 %v280_v8  ;;  %v210_v9 = vpop.f32.mrf.mxu2 }
  0xa5   :  { %v211_v60 = vadd.f32 %v970_v3, %v210_v9 }
  0xa6   :  { %v192_v10 = vpop.f32.mrf.mxu0 }
  0xa7   :  { %v193_v11 = vadd.f32 %v970_v3, %v192_v10 }
  0xa9   :  { %v978_v12 = vadd.f32 %v241_v1, %v193_v11 }
  0xaa   :  { %v271_v48 = vpop.f32.mrf.mxu3 }
  0xab   :  { %v283_v14 = vsel %vm279_vm3, %v978_v12, 0.0 }
  0xac   :  { %v249_v13 = vpop.f32.mrf.mxu1  ;;  %284 = vadd.xlane.f32.xlu0 %v283_v14  ;;  %v212_v15 = vpop.f32.mrf.mxu2 }
  0xad   :  { %v213_v62 = vadd.f32 %v970_v3, %v212_v15 }
  0xae   :  { %v195_v17 = vpop.f32.mrf.mxu0 }
  0xaf   :  { %v196_v18 = vadd.f32 %v970_v3, %v195_v17 }
  0xb1   :  { %v983_v19 = vadd.f32 %v244_v2, %v196_v18 }
  0xb2   :  { %v274_v63 = vpop.f32.mrf.mxu3 }
  0xb3   :  { %v286_v21 = vsel %vm279_vm3, %v983_v19, 0.0 }
  0xb4   :  { %v251_v20 = vpop.f32.mrf.mxu1  ;;  %287 = vadd.xlane.f32.xlu1 %v286_v21  ;;  %v215_v22 = vpop.f32.mrf.mxu2  ;;  %v802_v21 = vmov 32.0  }
  0xb5   :  { %v216_v23 = vadd.f32 %v970_v3, %v215_v22  ;;  %767 = vrcp.f32 %v802_v21 }
  0xb6   :  { %v197_v24 = vpop.f32.mrf.mxu0 }
  0xb7   :  { %v988_v26 = vadd.f32 %v264_v16, %v216_v23  ;;  %v198_v28 = vadd.f32 %v970_v3, %v197_v24 }
  0xb9   :  { %v310_v27 = vsel %vm279_vm3, %v988_v26, 0.0  ;;  %v994_v33 = vadd.f32 %v246_v7, %v198_v28 }
  0xba   :  { %v276_v16 = vpop.f32.mrf.mxu3 }
  0xbb   :  { %v289_v39 = vsel %vm279_vm3, %v994_v33, 0.0  ;;  %v768_v22 = vpop.eup %767 }
  0xbc   :  { %v254_v29 = vpop.f32.mrf.mxu1  ;;  %311 = vadd.xlane.f32.xlu1 %v310_v27  ;;  %v217_v30 = vpop.f32.mrf.mxu2  ;;  %v329_v23 = vmul.f32 32.0, %v768_v22  ;;  %vm333_vm4 = vweird.f32 %v768_v22 }
  0xbd   :  { %v218_v31 = vadd.f32 %v970_v3, %v217_v30 }
  0xbe   :  { %v200_v32 = vpop.f32.mrf.mxu0  ;;  %v330_v24 = vsub.f32 1.0, %v329_v23 }
  0xbf   :  { %v996_v34 = vadd.f32 %v266_v25, %v218_v31  ;;  %v201_v36 = vadd.f32 %v970_v3, %v200_v32 }
  0xc0   :  { %v331_v25 = vmul.f32 %v768_v22, %v330_v24 }
  0xc1   :  { %v313_v37 = vsel %vm279_vm3, %v996_v34, 0.0  ;;  %v1004_v43 = vadd.f32 %v249_v13, %v201_v36 }
  0xc2   :  { %314 = vadd.xlane.f32.xlu2 %v313_v37 }
  0xc3   :  { %v292_v46 = vsel %vm279_vm3, %v1004_v43, 0.0 }
  0xc4   :  { %v256_v38 = vpop.f32.mrf.mxu1  ;;  %290 = vadd.xlane.f32.xlu1 %v289_v39  ;;  %v220_v40 = vpop.f32.mrf.mxu2 }
  0xc5   :  { %v221_v41 = vadd.f32 %v970_v3, %v220_v40 }
  0xc6   :  { %v202_v42 = vpop.f32.mrf.mxu0 }
  0xc7   :  { %v1006_v44 = vadd.f32 %v269_v35, %v221_v41  ;;  %v203_v45 = vadd.f32 %v970_v3, %v202_v42 }
  0xc9   :  { %v316_v47 = vsel %vm279_vm3, %v1006_v44, 0.0  ;;  %v1014_v53 = vadd.f32 %v251_v20, %v203_v45 }
  0xca   :  { %293 = vadd.xlane.f32.xlu2 %v292_v46  ;;  %317 = vadd.xlane.f32.xlu0 %v316_v47 }
  0xcb   :  { %v295_v57 = vsel %vm279_vm3, %v1014_v53, 0.0 }
  0xcc   :  { %v259_v49 = vpop.f32.mrf.mxu1  ;;  %v222_v50 = vpop.f32.mrf.mxu2 }
  0xcd   :  { %v223_v51 = vadd.f32 %v970_v3, %v222_v50  ;;  %v1029_v1 = vadd.f32 %v259_v49, %v211_v60 }
  0xce   :  { %v205_v52 = vpop.f32.mrf.mxu0 }
  0xcf   :  { %v206_v54 = vadd.f32 %v970_v3, %v205_v52  ;;  %v1017_v55 = vadd.f32 %v271_v48, %v223_v51  ;;  %v304_v9 = vsel %vm279_vm3, %v1029_v1, 0.0 }
  0xd1   :  { %v1019_v56 = vadd.f32 %v254_v29, %v206_v54  ;;  %v319_v58 = vsel %vm279_vm3, %v1017_v55, 0.0 }
  0xd2   :  { %296 = vadd.xlane.f32.xlu2 %v295_v57  ;;  %320 = vadd.xlane.f32.xlu1 %v319_v58 }
  0xd3   :  { %v298_v59 = vsel %vm279_vm3, %v1019_v56, 0.0 }
  0xd4   :  { %v261_v61 = vpop.f32.mrf.mxu1  ;;  %299 = vadd.xlane.f32.xlu0 %v298_v59  ;;  %v225_v0 = vpop.f32.mrf.mxu2 }
  0xd5   :  { %v1031_v4 = vadd.f32 %v261_v61, %v213_v62  ;;  %v226_v8 = vadd.f32 %v970_v3, %v225_v0 }
  0xd6   :  { %v207_v2 = vpop.f32.mrf.mxu0 }
  0xd7   :  { %v208_v5 = vadd.f32 %v970_v3, %v207_v2  ;;  %v307_v11 = vsel %vm279_vm3, %v1031_v4, 0.0  ;;  %v1044_v15 = vadd.f32 %v274_v63, %v226_v8 }
  0xd9   :  { %v1034_v7 = vadd.f32 %v256_v38, %v208_v5  ;;  %v322_v18 = vsel %vm279_vm3, %v1044_v15, 0.0 }
  0xda   :  { %305 = vadd.xlane.f32.xlu2 %v304_v9 }
  0xdb   :  { %v301_v10 = vsel %vm279_vm3, %v1034_v7, 0.0 }
  0xdc   :  { %302 = vadd.xlane.f32.xlu1 %v301_v10  ;;  %308 = vadd.xlane.f32.xlu0 %v307_v11  ;;  %v227_v13 = vpop.f32.mrf.mxu2 }
  0xdd   :  { %v228_v14 = vadd.f32 %v970_v3, %v227_v13  ;;  %v332_v3 = vadd.f32 %v768_v22, %v331_v25 }
  0xdf   :  { %v1046_v17 = vadd.f32 %v276_v16, %v228_v14  ;;  %v1052_v27 = vsel %vm333_vm4, %v768_v22, %v332_v3 }
  0xe1   :  { %v325_v20 = vsel %vm279_vm3, %v1046_v17, 0.0 }
  0xe2   :  { %323 = vadd.xlane.f32.xlu2 %v322_v18 }
  0xe4   :  { %326 = vadd.xlane.f32.xlu0 %v325_v20 }
 0x117   :  { %v282_v28 = vpop.xlane.xlu0 %281 }
 0x118   :  { %v335_v29 = vmul.f32 %v1052_v27, %v282_v28 }
 0x11a   :  { %v1056_v30 = vsub.f32 %v973_v6, %v335_v29 }
 0x11c   :  { %v367_v31 = vmul.f32 %v1056_v30, %v1056_v30 }
 0x11e   :  { %v383_v32 = vsel %vm279_vm3, %v367_v31, 0.0 }
 0x11f   :  { %384 = vadd.xlane.f32.xlu1 %v383_v32  ;;  %v285_v35 = vpop.xlane.xlu0 %284 }
 0x120   :  { %v336_v36 = vmul.f32 %v1052_v27, %v285_v35 }
 0x122   :  { %v1063_v37 = vsub.f32 %v978_v12, %v336_v36 }
 0x124   :  { %v368_v38 = vmul.f32 %v1063_v37, %v1063_v37 }
 0x126   :  { %v386_v39 = vsel %vm279_vm3, %v368_v38, 0.0 }
 0x127   :  { %v288_v40 = vpop.xlane.xlu1 %287  ;;  %387 = vadd.xlane.f32.xlu2 %v386_v39 }
 0x128   :  { %v337_v6 = vmul.f32 %v1052_v27, %v288_v40 }
 0x12a   :  { %v1070_v41 = vsub.f32 %v983_v19, %v337_v6 }
 0x12c   :  { %v369_v42 = vmul.f32 %v1070_v41, %v1070_v41 }
 0x12e   :  { %v389_v45 = vsel %vm279_vm3, %v369_v42, 0.0 }
 0x12f   :  { %v312_v46 = vpop.xlane.xlu1 %311  ;;  %390 = vadd.xlane.f32.xlu0 %v389_v45 }
 0x130   :  { %v345_v12 = vmul.f32 %v1052_v27, %v312_v46 }
 0x132   :  { %v1077_v47 = vsub.f32 %v988_v26, %v345_v12 }
 0x134   :  { %v377_v48 = vmul.f32 %v1077_v47, %v1077_v47 }
 0x135   :  { %v315_v49 = vpop.xlane.xlu2 %314 }
 0x136   :  { %v413_v50 = vsel %vm279_vm3, %v377_v48, 0.0  ;;  %v346_v19 = vmul.f32 %v1052_v27, %v315_v49 }
 0x137   :  { %v291_v51 = vpop.xlane.xlu1 %290  ;;  %414 = vadd.xlane.f32.xlu2 %v413_v50 }
 0x138   :  { %v338_v52 = vmul.f32 %v1052_v27, %v291_v51  ;;  %v1085_v54 = vsub.f32 %v996_v34, %v346_v19 }
 0x13a   :  { %v1088_v57 = vsub.f32 %v994_v33, %v338_v52  ;;  %v378_v26 = vmul.f32 %v1085_v54, %v1085_v54 }
 0x13c   :  { %v370_v58 = vmul.f32 %v1088_v57, %v1088_v57  ;;  %v416_v59 = vsel %vm279_vm3, %v378_v26, 0.0 }
 0x13d   :  { %v294_v60 = vpop.xlane.xlu2 %293  ;;  %417 = vadd.xlane.f32.xlu0 %v416_v59  ;;  %v318_v61 = vpop.xlane.xlu0 %317 }
 0x13e   :  { %v392_v62 = vsel %vm279_vm3, %v370_v58, 0.0  ;;  %v339_v63 = vmul.f32 %v1052_v27, %v294_v60  ;;  %v347_v34 = vmul.f32 %v1052_v27, %v318_v61 }
 0x13f   :  { %393 = vadd.xlane.f32.xlu1 %v392_v62 }
 0x140   :  { %v1099_v33 = vsub.f32 %v1004_v43, %v339_v63  ;;  %v1102_v0 = vsub.f32 %v1006_v44, %v347_v34 }
 0x142   :  { %v371_v2 = vmul.f32 %v1099_v33, %v1099_v33  ;;  %v379_v5 = vmul.f32 %v1102_v0, %v1102_v0 }
 0x144   :  { %v395_v8 = vsel %vm279_vm3, %v371_v2, 0.0  ;;  %v419_v10 = vsel %vm279_vm3, %v379_v5, 0.0 }
 0x145   :  { %v297_v9 = vpop.xlane.xlu2 %296  ;;  %396 = vadd.xlane.f32.xlu2 %v395_v8  ;;  %v321_v13 = vpop.xlane.xlu1 %320 }
 0x146   :  { %v340_v11 = vmul.f32 %v1052_v27, %v297_v9  ;;  %v348_v29 = vmul.f32 %v1052_v27, %v321_v13  ;;  %v1172_v13 = vld [vmem:[%s1360_s3] ss:$0 sm:$0xff] }
 0x147   :  { %420 = vadd.xlane.f32.xlu1 %v419_v10  ;;  %v300_v43 = vpop.xlane.xlu0 %299 }
 0x148   :  { %v341_v44 = vmul.f32 %v1052_v27, %v300_v43  ;;  %v1113_v14 = vsub.f32 %v1014_v53, %v340_v11  ;;  %v1145_v39 = vsub.f32 %v1017_v55, %v348_v29 }
 0x14a   :  { %v1116_v16 = vsub.f32 %v1019_v56, %v341_v44  ;;  %v372_v18 = vmul.f32 %v1113_v14, %v1113_v14  ;;  %v380_v55 = vmul.f32 %v1145_v39, %v1145_v39 }
 0x14c   :  { %v373_v20 = vmul.f32 %v1116_v16, %v1116_v16  ;;  %v398_v21 = vsel %vm279_vm3, %v372_v18, 0.0  ;;  %v422_v19 = vsel %vm279_vm3, %v380_v55, 0.0  ;;  %v1177_v18 = vld [vmem:[%s1361_s4] ss:$0 sm:$0xff] }
 0x14d   :  { %v306_v22 = vpop.xlane.xlu2 %305  ;;  %399 = vadd.xlane.f32.xlu0 %v398_v21 }
 0x14e   :  { %v401_v23 = vsel %vm279_vm3, %v373_v20, 0.0  ;;  %v343_v24 = vmul.f32 %v1052_v27, %v306_v22 }
 0x14f   :  { %v303_v25 = vpop.xlane.xlu1 %302  ;;  %402 = vadd.xlane.f32.xlu1 %v401_v23  ;;  %v309_v53 = vpop.xlane.xlu0 %308 }
 0x150   :  { %v342_v56 = vmul.f32 %v1052_v27, %v303_v25  ;;  %v344_v3 = vmul.f32 %v1052_v27, %v309_v53  ;;  %v1128_v28 = vsub.f32 %v1029_v1, %v343_v24 }
 0x152   :  { %v1132_v31 = vsub.f32 %v1034_v7, %v342_v56  ;;  %v1135_v32 = vsub.f32 %v1031_v4, %v344_v3  ;;  %v375_v35 = vmul.f32 %v1128_v28, %v1128_v28 }
 0x154   :  { %v374_v36 = vmul.f32 %v1132_v31, %v1132_v31  ;;  %v376_v38 = vmul.f32 %v1135_v32, %v1135_v32  ;;  %v407_v1 = vsel %vm279_vm3, %v375_v35, 0.0 }
 0x155   :  { %v324_v40 = vpop.xlane.xlu2 %323  ;;  %408 = vadd.xlane.f32.xlu0 %v407_v1 }
 0x156   :  { %v404_v7 = vsel %vm279_vm3, %v374_v36, 0.0  ;;  %v410_v4 = vsel %vm279_vm3, %v376_v38, 0.0  ;;  %v349_v6 = vmul.f32 %v1052_v27, %v324_v40 }
 0x157   :  { %405 = vadd.xlane.f32.xlu2 %v404_v7  ;;  %411 = vadd.xlane.f32.xlu1 %v410_v4  ;;  %v327_v42 = vpop.xlane.xlu0 %326 }
 0x158   :  { %v350_v45 = vmul.f32 %v1052_v27, %v327_v42  ;;  %v1152_v46 = vsub.f32 %v1044_v15, %v349_v6 }
 0x15a   :  { %v1155_v12 = vsub.f32 %v1046_v17, %v350_v45  ;;  %v381_v48 = vmul.f32 %v1152_v46, %v1152_v46 }
 0x15c   :  { %v382_v49 = vmul.f32 %v1155_v12, %v1155_v12  ;;  %v425_v50 = vsel %vm279_vm3, %v381_v48, 0.0 }
 0x15d   :  { %426 = vadd.xlane.f32.xlu0 %v425_v50 }
 0x15e   :  { %v428_v15 = vsel %vm279_vm3, %v382_v49, 0.0 }
 0x15f   :  { %423 = vadd.xlane.f32.xlu2 %v422_v19  ;;  %429 = vadd.xlane.f32.xlu1 %v428_v15 }
 0x192   :  { %v385_v17 = vpop.xlane.xlu1 %384 }
 0x193   :  { %v431_v51 = vmul.f32 %v385_v17, %v1052_v27 }
 0x195   :  { %v447_v52 = vadd.f32 1e-05, %v431_v51 }
 0x197   :  { %769 = vrsqrt.f32 %v447_v52  ;;  %vm469_vm6 = vweird.f32 %v447_v52 }
 0x19a   :  { %v388_v26 = vpop.xlane.xlu2 %387 }
 0x19b   :  { %v432_v58 = vmul.f32 %v388_v26, %v1052_v27 }
 0x19d   :  { %v770_v59 = vpop.eup %769  ;;  %v448_v60 = vadd.f32 1e-05, %v432_v58 }
 0x19e   :  { %v464_v61 = vmul.f32 %v770_v59, %v447_v52  ;;  %vm470_vm5 = vweird.f32 %v770_v59 }
 0x19f   :  { %771 = vrsqrt.f32 %v448_v60  ;;  %vm471_vm7 = vmor %vm469_vm6, %vm470_vm5  ;;  %vm479_vm9 = vweird.f32 %v448_v60 }
 0x1a0   :  { %v465_v62 = vmul.f32 %v770_v59, %v464_v61 }
 0x1a2   :  { %v466_v63 = vmul.f32 0.5, %v465_v62  ;;  %v391_v34 = vpop.xlane.xlu0 %390 }
 0x1a3   :  { %v433_v2 = vmul.f32 %v391_v34, %v1052_v27 }
 0x1a4   :  { %v467_v5 = vsub.f32 1.5, %v466_v63 }
 0x1a5   :  { %v772_v8 = vpop.eup %771  ;;  %v449_v9 = vadd.f32 1e-05, %v433_v2 }
 0x1a6   :  { %v468_v10 = vmul.f32 %v770_v59, %v467_v5  ;;  %v474_v11 = vmul.f32 %v772_v8, %v448_v60  ;;  %vm480_vm8 = vweird.f32 %v772_v8 }
 0x1a7   :  { %773 = vrsqrt.f32 %v449_v9  ;;  %vm481_vm10 = vmor %vm479_vm9, %vm480_vm8  ;;  %vm489_vm12 = vweird.f32 %v449_v9 }
 0x1a8   :  { %v472_v43 = vsel %vm471_vm7, %v770_v59, %v468_v10  ;;  %v475_v44 = vmul.f32 %v772_v8, %v474_v11 }
 0x1a9   :  { %v623_v20 = vmul.f32 %v472_v43, %v1056_v30 }
 0x1aa   :  { %v476_v21 = vmul.f32 0.5, %v475_v44  ;;  %v415_v22 = vpop.xlane.xlu2 %414 }
 0x1ab   :  { %v643_v23 = vmul.f32 %v1172_v13, %v623_v20  ;;  %v441_v24 = vmul.f32 %v415_v22, %v1052_v27 }
 0x1ac   :  { %v477_v25 = vsub.f32 1.5, %v476_v21 }
 0x1ad   :  { %v774_v53 = vpop.eup %773  ;;  %v663_v56 = vadd.f32 %v1177_v18, %v643_v23  ;;  %v457_v3 = vadd.f32 1e-05, %v441_v24 }
 0x1ae   :  { %v478_v29 = vmul.f32 %v772_v8, %v477_v25  ;;  %v484_v35 = vmul.f32 %v774_v53, %v449_v9  ;;  %vm490_vm11 = vweird.f32 %v774_v53 }
 0x1af   :  { %679 = vst.msk [vmem:[%s1362_s5] sm:$0xff] %vm279_vm3, %v663_v56  ;;  %775 = vrsqrt.f32 %v457_v3  ;;  %vm491_vm13 = vmor %vm489_vm12, %vm490_vm11  ;;  %vm569_vm15 = vweird.f32 %v457_v3 }
 0x1b0   :  { %v482_v30 = vsel %vm481_vm10, %v772_v8, %v478_v29  ;;  %v485_v36 = vmul.f32 %v774_v53, %v484_v35  ;;  %v418_v1 = vpop.xlane.xlu0 %417 }
 0x1b1   :  { %v624_v38 = vmul.f32 %v482_v30, %v1063_v37  ;;  %v442_v7 = vmul.f32 %v418_v1, %v1052_v27 }
 0x1b2   :  { %v486_v40 = vmul.f32 0.5, %v485_v36  ;;  %v394_v4 = vpop.xlane.xlu1 %393 }
 0x1b3   :  { %v644_v6 = vmul.f32 %v1172_v13, %v624_v38  ;;  %v434_v42 = vmul.f32 %v394_v4, %v1052_v27  ;;  %v458_v55 = vadd.f32 1e-05, %v442_v7 }
 0x1b4   :  { %v487_v45 = vsub.f32 1.5, %v486_v40 }
 0x1b5   :  { %v776_v48 = vpop.eup %775  ;;  %v664_v49 = vadd.f32 %v1177_v18, %v644_v6  ;;  %v450_v50 = vadd.f32 1e-05, %v434_v42  ;;  %777 = vrsqrt.f32 %v458_v55  ;;  %vm579_vm4 = vweird.f32 %v458_v55 }
 0x1b6   :  { %v488_v19 = vmul.f32 %v774_v53, %v487_v45  ;;  %v564_v15 = vmul.f32 %v776_v48, %v457_v3  ;;  %vm570_vm14 = vweird.f32 %v776_v48 }
 0x1b7   :  { %680 = vst.msk [vmem:[%s1362_s5 + $0x8] sm:$0xff] %vm279_vm3, %v664_v49  ;;  %779 = vrsqrt.f32 %v450_v50  ;;  %vm571_vm0 = vmor %vm569_vm15, %vm570_vm14  ;;  %vm499_vm6 = vweird.f32 %v450_v50 }
 0x1b8   :  { %v492_v37 = vsel %vm491_vm13, %v774_v53, %v488_v19  ;;  %v565_v17 = vmul.f32 %v776_v48, %v564_v15  ;;  %v397_v52 = vpop.xlane.xlu2 %396 }
 0x1b9   :  { %v625_v51 = vmul.f32 %v492_v37, %v1070_v41  ;;  %v435_v58 = vmul.f32 %v397_v52, %v1052_v27 }
 0x1ba   :  { %v566_v26 = vmul.f32 0.5, %v565_v17  ;;  %v421_v59 = vpop.xlane.xlu1 %420 }
 0x1bb   :  { %v645_v60 = vmul.f32 %v1172_v13, %v625_v51  ;;  %v443_v61 = vmul.f32 %v421_v59, %v1052_v27  ;;  %v778_v62 = vpop.eup %777  ;;  %v1200_v34 = vadd.f32 1e-05, %v435_v58 }
 0x1bc   :  { %v567_v63 = vsub.f32 1.5, %v566_v26  ;;  %v574_v8 = vmul.f32 %v778_v62, %v458_v55  ;;  %vm580_vm1 = vweird.f32 %v778_v62 }
 0x1bd   :  { %v780_v2 = vpop.eup %779  ;;  %v665_v5 = vadd.f32 %v1177_v18, %v645_v60  ;;  %v1203_v9 = vadd.f32 1e-05, %v443_v61  ;;  %781 = vrsqrt.f32 %v1200_v34  ;;  %vm581_vm5 = vmor %vm579_vm4, %vm580_vm1  ;;  %vm509_vm10 = vweird.f32 %v1200_v34 }
 0x1be   :  { %v568_v41 = vmul.f32 %v776_v48, %v567_v63  ;;  %v494_v10 = vmul.f32 %v780_v2, %v450_v50  ;;  %v575_v11 = vmul.f32 %v778_v62, %v574_v8  ;;  %vm500_vm2 = vweird.f32 %v780_v2 }
 0x1bf   :  { %681 = vst.msk [vmem:[%s1362_s5 + $0x10] sm:$0xff] %vm279_vm3, %v665_v5  ;;  %783 = vrsqrt.f32 %v1203_v9  ;;  %vm501_vm7 = vmor %vm499_vm6, %vm500_vm2  ;;  %vm589_vm12 = vweird.f32 %v1203_v9 }
 0x1c0   :  { %v572_v43 = vsel %vm571_vm0, %v776_v48, %v568_v41  ;;  %v495_v44 = vmul.f32 %v780_v2, %v494_v10  ;;  %v576_v21 = vmul.f32 0.5, %v575_v11  ;;  %v400_v22 = vpop.xlane.xlu0 %399 }
 0x1c1   :  { %v633_v20 = vmul.f32 %v572_v43, %v1077_v47  ;;  %v436_v24 = vmul.f32 %v400_v22, %v1052_v27 }
 0x1c2   :  { %v496_v23 = vmul.f32 0.5, %v495_v44  ;;  %v403_v25 = vpop.xlane.xlu1 %402  ;;  %v577_v56 = vsub.f32 1.5, %v576_v21 }
 0x1c3   :  { %v653_v53 = vmul.f32 %v1172_v13, %v633_v20  ;;  %v437_v3 = vmul.f32 %v403_v25, %v1052_v27  ;;  %v782_v29 = vpop.eup %781  ;;  %v1215_v30 = vadd.f32 1e-05, %v436_v24 }
 0x1c4   :  { %v497_v35 = vsub.f32 1.5, %v496_v23  ;;  %v578_v38 = vmul.f32 %v778_v62, %v577_v56  ;;  %v504_v1 = vmul.f32 %v782_v29, %v1200_v34  ;;  %vm510_vm8 = vweird.f32 %v782_v29 }
 0x1c5   :  { %v784_v36 = vpop.eup %783  ;;  %v673_v47 = vadd.f32 %v1177_v18, %v653_v53  ;;  %785 = vrsqrt.f32 %v1215_v30  ;;  %v1225_v42 = vadd.f32 1e-05, %v437_v3  ;;  %vm511_vm11 = vmor %vm509_vm10, %vm510_vm8  ;;  %vm519_vm15 = vweird.f32 %v1215_v30 }
 0x1c6   :  { %v498_v40 = vmul.f32 %v780_v2, %v497_v35  ;;  %v584_v7 = vmul.f32 %v784_v36, %v1203_v9  ;;  %v582_v4 = vsel %vm581_vm5, %v778_v62, %v578_v38  ;;  %v505_v6 = vmul.f32 %v782_v29, %v504_v1 }
 0x1c7   :  { %689 = vst.msk [vmem:[%s1362_s5 + $0x50] sm:$0xff] %vm279_vm3, %v673_v47  ;;  %v634_v45 = vmul.f32 %v582_v4, %v1085_v54  ;;  %787 = vrsqrt.f32 %v1225_v42  ;;  %vm590_vm9 = vweird.f32 %v784_v36  ;;  %vm529_vm2 = vweird.f32 %v1225_v42 }
 0x1c8   :  { %v502_v55 = vsel %vm501_vm7, %v780_v2, %v498_v40  ;;  %v585_v48 = vmul.f32 %v784_v36, %v584_v7  ;;  %v506_v50 = vmul.f32 0.5, %v505_v6  ;;  %v409_v19 = vpop.xlane.xlu0 %408  ;;  %vm591_vm13 = vmor %vm589_vm12, %vm590_vm9 }
 0x1c9   :  { %v626_v49 = vmul.f32 %v502_v55, %v1088_v57  ;;  %v654_v15 = vmul.f32 %v1172_v13, %v634_v45  ;;  %v439_v17 = vmul.f32 %v409_v19, %v1052_v27 }
 0x1ca   :  { %v586_v37 = vmul.f32 0.5, %v585_v48  ;;  %v406_v51 = vpop.xlane.xlu2 %405  ;;  %v412_v52 = vpop.xlane.xlu1 %411  ;;  %v507_v58 = vsub.f32 1.5, %v506_v50 }
 0x1cb   :  { %v646_v26 = vmul.f32 %v1172_v13, %v626_v49  ;;  %v438_v54 = vmul.f32 %v406_v51, %v1052_v27  ;;  %v440_v59 = vmul.f32 %v412_v52, %v1052_v27  ;;  %v786_v57 = vpop.eup %785  ;;  %v674_v60 = vadd.f32 %v1177_v18, %v654_v15 }
 0x1cc   :  { %v587_v61 = vsub.f32 1.5, %v586_v37  ;;  %v1236_v62 = vadd.f32 1e-05, %v439_v17  ;;  %v508_v2 = vmul.f32 %v782_v29, %v507_v58  ;;  %v514_v5 = vmul.f32 %v786_v57, %v1215_v30 }
 0x1cd   :  { %v666_v63 = vadd.f32 %v1177_v18, %v646_v26  ;;  %690 = vst.msk [vmem:[%s1362_s5 + $0x58] sm:$0xff] %vm279_vm3, %v674_v60  ;;  %v1248_v41 = vadd.f32 1e-05, %v438_v54  ;;  %v788_v10 = vpop.eup %787  ;;  %v1255_v43 = vadd.f32 1e-05, %v440_v59  ;;  %vm520_vm14 = vweird.f32 %v786_v57 }
 0x1ce   :  { %v588_v8 = vmul.f32 %v784_v36, %v587_v61  ;;  %789 = vrsqrt.f32 %v1236_v62  ;;  %v512_v34 = vsel %vm511_vm11, %v782_v29, %v508_v2  ;;  %v515_v11 = vmul.f32 %v786_v57, %v514_v5  ;;  %vm521_vm0 = vmor %vm519_vm15, %vm520_vm14 }
 0x1cf   :  { %682 = vst.msk [vmem:[%s1362_s5 + $0x18] sm:$0xff] %vm279_vm3, %v666_v63  ;;  %v627_v44 = vmul.f32 %v512_v34, %v1099_v33  ;;  %v524_v9 = vmul.f32 %v788_v10, %v1225_v42  ;;  %791 = vrsqrt.f32 %v1248_v41  ;;  %vm530_vm1 = vweird.f32 %v788_v10 }
 0x1d0   :  { %v592_v20 = vsel %vm591_vm13, %v784_v36, %v588_v8  ;;  %v516_v22 = vmul.f32 0.5, %v515_v11  ;;  %v427_v23 = vpop.xlane.xlu0 %426  ;;  %793 = vrsqrt.f32 %v1255_v43  ;;  %vm531_vm4 = vmor %vm529_vm2, %vm530_vm1  ;;  %vm549_vm6 = vweird.f32 %v1236_v62 }
 0x1d1   :  { %v635_v21 = vmul.f32 %v592_v20, %v1102_v0  ;;  %v647_v24 = vmul.f32 %v1172_v13, %v627_v44  ;;  %v525_v25 = vmul.f32 %v788_v10, %v524_v9  ;;  %v445_v29 = vmul.f32 %v427_v23, %v1052_v27 }
 0x1d2   :  { %v424_v53 = vpop.xlane.xlu2 %423  ;;  %v430_v56 = vpop.xlane.xlu1 %429  ;;  %v517_v33 = vsub.f32 1.5, %v516_v22  ;;  %vm539_vm10 = vweird.f32 %v1248_v41  ;;  %vm559_vm12 = vweird.f32 %v1255_v43 }
 0x1d3   :  { %v655_v3 = vmul.f32 %v1172_v13, %v635_v21  ;;  %v444_v35 = vmul.f32 %v424_v53, %v1052_v27  ;;  %v667_v36 = vadd.f32 %v1177_v18, %v647_v24  ;;  %v526_v47 = vmul.f32 0.5, %v525_v25 }
 0x1d4   :  { %v790_v0 = vpop.eup %789  ;;  %v446_v38 = vmul.f32 %v430_v56, %v1052_v27  ;;  %v518_v40 = vmul.f32 %v786_v57, %v517_v33  ;;  %v1276_v6 = vadd.f32 1e-05, %v445_v29 }
 0x1d5   :  { %v675_v1 = vadd.f32 %v1177_v18, %v655_v3  ;;  %v544_v7 = vmul.f32 %v790_v0, %v1236_v62  ;;  %683 = vst.msk [vmem:[%s1362_s5 + $0x20] sm:$0xff] %vm279_vm3, %v667_v36  ;;  %v527_v4 = vsub.f32 1.5, %v526_v47  ;;  %v792_v45 = vpop.eup %791  ;;  %v1283_v55 = vadd.f32 1e-05, %v444_v35 }
 0x1d6   :  { %v522_v27 = vsel %vm521_vm0, %v786_v57, %v518_v40  ;;  %v794_v48 = vpop.eup %793  ;;  %v534_v19 = vmul.f32 %v792_v45, %v1248_v41  ;;  %v1287_v15 = vadd.f32 1e-05, %v446_v38  ;;  %795 = vrsqrt.f32 %v1276_v6 }
 0x1d7   :  { %691 = vst.msk [vmem:[%s1362_s5 + $0x60] sm:$0xff] %vm279_vm3, %v675_v1  ;;  %v545_v30 = vmul.f32 %v790_v0, %v544_v7  ;;  %v628_v49 = vmul.f32 %v522_v27, %v1113_v14  ;;  %v528_v50 = vmul.f32 %v788_v10, %v527_v4  ;;  %v554_v17 = vmul.f32 %v794_v48, %v1255_v43 }
 0x1d8   :  { %vm550_vm5 = vweird.f32 %v790_v0  ;;  %v535_v52 = vmul.f32 %v792_v45, %v534_v19  ;;  %797 = vrsqrt.f32 %v1283_v55  ;;  %vm540_vm8 = vweird.f32 %v792_v45 }
 0x1d9   :  { %v546_v37 = vmul.f32 0.5, %v545_v30  ;;  %v648_v51 = vmul.f32 %v1172_v13, %v628_v49  ;;  %v532_v42 = vsel %vm531_vm4, %v788_v10, %v528_v50  ;;  %v555_v14 = vmul.f32 %v794_v48, %v554_v17  ;;  %vm551_vm7 = vmor %vm549_vm6, %vm550_vm5 }
 0x1da   :  { %v629_v26 = vmul.f32 %v532_v42, %v1116_v16  ;;  %v536_v59 = vmul.f32 0.5, %v535_v52  ;;  %799 = vrsqrt.f32 %v1287_v15  ;;  %vm560_vm9 = vweird.f32 %v794_v48  ;;  %vm541_vm11 = vmor %vm539_vm10, %vm540_vm8 }
 0x1db   :  { %v547_v58 = vsub.f32 1.5, %v546_v37  ;;  %v668_v54 = vadd.f32 %v1177_v18, %v648_v51  ;;  %v556_v61 = vmul.f32 0.5, %v555_v14  ;;  %vm561_vm13 = vmor %vm559_vm12, %vm560_vm9  ;;  %vm609_vm15 = vweird.f32 %v1276_v6 }
 0x1dc   :  { %v649_v57 = vmul.f32 %v1172_v13, %v629_v26  ;;  %v537_v16 = vsub.f32 1.5, %v536_v59  ;;  %v796_v63 = vpop.eup %795  ;;  %vm599_vm4 = vweird.f32 %v1283_v55  ;;  %vm619_vm6 = vweird.f32 %v1287_v15 }
 0x1dd   :  { %v548_v60 = vmul.f32 %v790_v0, %v547_v58  ;;  %684 = vst.msk [vmem:[%s1362_s5 + $0x28] sm:$0xff] %vm279_vm3, %v668_v54  ;;  %v557_v8 = vsub.f32 1.5, %v556_v61  ;;  %v604_v62 = vmul.f32 %v796_v63, %v1276_v6  ;;  %vm610_vm14 = vweird.f32 %v796_v63 }
 0x1de   :  { %v669_v2 = vadd.f32 %v1177_v18, %v649_v57  ;;  %v538_v34 = vmul.f32 %v792_v45, %v537_v16  ;;  %v798_v11 = vpop.eup %797  ;;  %vm611_vm1 = vmor %vm609_vm15, %vm610_vm14 }
 0x1df   :  { %v552_v5 = vsel %vm551_vm7, %v790_v0, %v548_v60  ;;  %v558_v44 = vmul.f32 %v794_v48, %v557_v8  ;;  %v594_v41 = vmul.f32 %v798_v11, %v1283_v55  ;;  %vm600_vm0 = vweird.f32 %v798_v11 }
 0x1e0   :  { %v631_v10 = vmul.f32 %v552_v5, %v1128_v28  ;;  %685 = vst.msk [vmem:[%s1362_s5 + $0x30] sm:$0xff] %vm279_vm3, %v669_v2  ;;  %v800_v20 = vpop.eup %799  ;;  %v542_v21 = vsel %vm541_vm11, %v792_v45, %v538_v34  ;;  %v605_v28 = vmul.f32 %v796_v63, %v604_v62  ;;  %vm601_vm5 = vmor %vm599_vm4, %vm600_vm0 }
 0x1e1   :  { %v630_v22 = vmul.f32 %v542_v21, %v1132_v31  ;;  %v562_v23 = vsel %vm561_vm13, %v794_v48, %v558_v44  ;;  %v614_v24 = vmul.f32 %v800_v20, %v1287_v15  ;;  %v595_v3 = vmul.f32 %v798_v11, %v594_v41 }
 0x1e2   :  { %v651_v9 = vmul.f32 %v1172_v13, %v631_v10  ;;  %v632_v53 = vmul.f32 %v562_v23, %v1135_v32  ;;  %v606_v56 = vmul.f32 0.5, %v605_v28  ;;  %vm620_vm2 = vweird.f32 %v800_v20 }
 0x1e3   :  { %v650_v43 = vmul.f32 %v1172_v13, %v630_v22  ;;  %v615_v33 = vmul.f32 %v800_v20, %v614_v24  ;;  %v596_v35 = vmul.f32 0.5, %v595_v3  ;;  %vm621_vm7 = vmor %vm619_vm6, %vm620_vm2 }
 0x1e4   :  { %v671_v25 = vadd.f32 %v1177_v18, %v651_v9  ;;  %v652_v29 = vmul.f32 %v1172_v13, %v632_v53  ;;  %v607_v31 = vsub.f32 1.5, %v606_v56 }
 0x1e5   :  { %v670_v0 = vadd.f32 %v1177_v18, %v650_v43  ;;  %v616_v32 = vmul.f32 0.5, %v615_v33  ;;  %v597_v38 = vsub.f32 1.5, %v596_v35 }
 0x1e6   :  { %687 = vst.msk [vmem:[%s1362_s5 + $0x40] sm:$0xff] %vm279_vm3, %v671_v25  ;;  %v672_v36 = vadd.f32 %v1177_v18, %v652_v29  ;;  %v608_v47 = vmul.f32 %v796_v63, %v607_v31 }
 0x1e7   :  { %686 = vst.msk [vmem:[%s1362_s5 + $0x38] sm:$0xff] %vm279_vm3, %v670_v0  ;;  %v617_v1 = vsub.f32 1.5, %v616_v32  ;;  %v598_v7 = vmul.f32 %v798_v11, %v597_v38 }
 0x1e8   :  { %688 = vst.msk [vmem:[%s1362_s5 + $0x48] sm:$0xff] %vm279_vm3, %v672_v36  ;;  %v612_v40 = vsel %vm611_vm1, %v796_v63, %v608_v47 }
 0x1e9   :  { %v637_v4 = vmul.f32 %v612_v40, %v1152_v46  ;;  %v618_v6 = vmul.f32 %v800_v20, %v617_v1  ;;  %v602_v45 = vsel %vm601_vm5, %v798_v11, %v598_v7 }
 0x1ea   :  { %v636_v30 = vmul.f32 %v602_v45, %v1145_v39 }
 0x1eb   :  { %v657_v27 = vmul.f32 %v1172_v13, %v637_v4  ;;  %v622_v48 = vsel %vm621_vm7, %v800_v20, %v618_v6 }
 0x1ec   :  { %v638_v49 = vmul.f32 %v622_v48, %v1155_v12  ;;  %v656_v19 = vmul.f32 %v1172_v13, %v636_v30 }
 0x1ed   :  { %v677_v50 = vadd.f32 %v1177_v18, %v657_v27 }
 0x1ee   :  { %v658_v55 = vmul.f32 %v1172_v13, %v638_v49  ;;  %v676_v46 = vadd.f32 %v1177_v18, %v656_v19 }
 0x1ef   :  { %693 = vst.msk [vmem:[%s1362_s5 + $0x70] sm:$0xff] %vm279_vm3, %v677_v50 }
 0x1f0   :  { %v678_v15 = vadd.f32 %v1177_v18, %v658_v55  ;;  %692 = vst.msk [vmem:[%s1362_s5 + $0x68] sm:$0xff] %vm279_vm3, %v676_v46 }
 0x1f2   :  { %694 = vst.msk [vmem:[%s1362_s5 + $0x78] sm:$0xff] %vm279_vm3, %v678_v15 }

</bundles_post_ra>
